<compile_context>
chip_gen: v5e
topology: v5e:2x2
jax: 0.10.0
libtpu: 0.0.40
codegen_flags: <defaults>
</compile_context>

<pallas_src>
import jax
import jax.numpy as jnp
from jax import lax
from jax.experimental import pallas as pl
from jax.experimental.pallas import tpu as pltpu


# ----------------------------- fused Pallas kernel -----------------------------

def _make_mha_kernel(batch, num_heads, head_size):
    B, H, D = batch, num_heads, head_size
    HD = H * D

    def kernel(x_ref, wqkv_ref, wp_ref, b_ref, o_ref):
        """Single grid step for the whole batch.

        x_ref    : (B, T, C)   bf16 input
        wqkv_ref : (C, 3*H*D)  bf16  [Q heads | K heads (1/sqrt(D) folded) | V heads]
        wp_ref   : (H, D, C)   bf16  per-head rows of the output-projection weight^T
        b_ref    : (1, C)      f32   output-projection bias
        o_ref    : (B, T, C)   f32   output
        """
        _, T, C = x_ref.shape
        BT = B * T

        x2 = x_ref[...].reshape(BT, C)                       # bf16 (B*T, C)

        # One fused QKV matmul on the MXU: (B*T, C) @ (C, 3*H*D), f32 accumulate,
        # then a single bf16 cast of the whole qkv tile.
        qkv = jnp.dot(x2, wqkv_ref[...],
                      preferred_element_type=jnp.float32)    # (B*T, 3*H*D) f32
        qkv = qkv.astype(jnp.bfloat16)

        # Additive causal mask bias (0 / -1e30), hoisted out of the head loop.
        row = lax.broadcasted_iota(jnp.int32, (T, T), 0)
        col = lax.broadcasted_iota(jnp.int32, (T, T), 1)
        mask_bias = jnp.where(col <= row, 0.0, -1e30).astype(jnp.float32)

        y = jnp.zeros((BT, C), jnp.float32)
        for h in range(H):                                   # static unroll (H small)
            q = qkv[:, 0 * HD + h * D:0 * HD + (h + 1) * D].reshape(B, T, D)
            k = qkv[:, 1 * HD + h * D:1 * HD + (h + 1) * D].reshape(B, T, D)
            v = qkv[:, 2 * HD + h * D:2 * HD + (h + 1) * D].reshape(B, T, D)

            # scores = q @ k^T  (1/sqrt(D) already folded into K weights)
            s = jnp.einsum('bqd,bkd->bqk', q, k,
                           preferred_element_type=jnp.float32)   # (B, T, T) f32
            s = s + mask_bias

            # numerically-stable softmax, all f32
            s = s - jnp.max(s, axis=-1, keepdims=True)
            p = jnp.exp(s)
            p = p * pl.reciprocal(jnp.sum(p, axis=-1, keepdims=True))

            head = jnp.einsum('bqk,bkd->bqd', p.astype(jnp.bfloat16), v,
                              preferred_element_type=jnp.float32)  # (B, T, D) f32

            # accumulate the output projection per head (no lane concat)
            y = y + jnp.dot(head.reshape(BT, D).astype(jnp.bfloat16), wp_ref[h],
                            preferred_element_type=jnp.float32)    # (B*T, C)

        y = y + b_ref[...]                                   # (1, C) broadcast
        o_ref[...] = y.reshape(B, T, C).astype(o_ref.dtype)

    return kernel


# ----------------------------- wrapper -----------------------------

def prepare_params(wq, wk, wv, wp_t, bp):
    """One-time host-side parameter prep.

    wq/wk/wv : (H, C, D) f32   per-head projection weights (no bias)
    wp_t     : (H*D, C)  f32   transposed output-projection weight
    bp       : (C,)      f32   output-projection bias
    Returns (w_qkv bf16 (C, 3*H*D), wp_heads bf16 (H, D, C), bp f32) with the
    1/sqrt(D) attention scale folded into the K block.
    """
    H, C, D = wq.shape
    scale = jnp.float32(D) ** -0.5
    q_cols = jnp.transpose(wq, (1, 0, 2)).reshape(C, H * D)
    k_cols = jnp.transpose(wk * scale, (1, 0, 2)).reshape(C, H * D)
    v_cols = jnp.transpose(wv, (1, 0, 2)).reshape(C, H * D)
    w_qkv = jnp.concatenate([q_cols, k_cols, v_cols], axis=1).astype(jnp.bfloat16)
    wp_heads = wp_t.reshape(H, D, C).astype(jnp.bfloat16)
    return w_qkv, wp_heads, bp.astype(jnp.float32)


def multi_head_attention(x, w_qkv, wp_heads, bp, *, num_heads, head_size):
    """
    x        : (B, T, C) f32
    w_qkv    : (C, 3*H*D) bf16  (from prepare_params)
    wp_heads : (H, D, C)  bf16
    bp       : (C,)       f32
    returns  : (B, T, C)  f32
    """
    B, T, C = x.shape
    H, D = num_heads, head_size
    HD = H * D

    flops = (2 * B * T * C * 3 * HD        # fused QKV projection
             + 2 * B * H * T * T * D * 2   # scores + attn @ v
             + 2 * B * T * HD * C)         # output projection
    transcendentals = B * H * T * T        # exp in softmax
    bytes_accessed = (B * T * C * 2        # bf16 input
                      + w_qkv.size * 2 + wp_heads.size * 2
                      + bp.size * 4 + B * T * C * 4)

    kernel = _make_mha_kernel(B, H, D)
    return pl.pallas_call(
        kernel,
        out_shape=jax.ShapeDtypeStruct((B, T, C), jnp.float32),
        grid_spec=pl.GridSpec(
            grid=(1,),                     # whole batch in one step
            in_specs=[
                pl.BlockSpec((B, T, C), lambda i: (0, 0, 0)),
                pl.BlockSpec((C, 3 * HD), lambda i: (0, 0)),
                pl.BlockSpec((H, D, C), lambda i: (0, 0, 0)),
                pl.BlockSpec((1, C), lambda i: (0, 0)),
            ],
            out_specs=pl.BlockSpec((B, T, C), lambda i: (0, 0, 0)),
        ),
        compiler_params=pltpu.CompilerParams(
            dimension_semantics=("arbitrary",)),
        cost_estimate=pl.CostEstimate(
            flops=flops,
            transcendentals=transcendentals,
            bytes_accessed=bytes_accessed),
    )(x.astype(jnp.bfloat16), w_qkv, wp_heads, bp.reshape(1, C))


# ----------------------------- reference (pure JAX, f32) -----------------------------

def _reference(x, wq, wk, wv, wp_t, bp):
    B, T, C = x.shape
    H, _, D = wq.shape
    outs = []
    for h in range(H):
        q = x @ wq[h]
        k = x @ wk[h]
        v = x @ wv[h]
        wei = (q @ jnp.swapaxes(k, -2, -1)) * (D ** -0.5)
        mask = jnp.tril(jnp.ones((T, T)))
        wei = jnp.where(mask == 0, -jnp.inf, wei)
        wei = jax.nn.softmax(wei, axis=-1)
        outs.append(wei @ v)
    cat = jnp.concatenate(outs, axis=-1)
    return cat @ wp_t + bp


# ----------------------------- main -----------------------------

if __name__ == "__main__":
    # hyperparams (small, consistent with the module):
    B = 2                      # batch
    T = 8                      # block_size (sequence length)
    C = 32                     # embedding_dimension
    H = 4                      # num_heads
    D = 8                      # head_size  (H * D == C)

    key = jax.random.PRNGKey(0)
    kx, kq, kk, kv, kp, kb = jax.random.split(key, 6)

    x = jax.random.normal(kx, (B, T, C), dtype=jnp.float32)

    # deterministic parameter init (Linear without bias for q/k/v; proj has bias)
    s_in = 1.0 / jnp.sqrt(C)
    wq = jax.random.uniform(kq, (H, C, D), minval=-s_in, maxval=s_in, dtype=jnp.float32)
    wk = jax.random.uniform(kk, (H, C, D), minval=-s_in, maxval=s_in, dtype=jnp.float32)
    wv = jax.random.uniform(kv, (H, C, D), minval=-s_in, maxval=s_in, dtype=jnp.float32)

    s_p = 1.0 / jnp.sqrt(H * D)
    wp_t = jax.random.uniform(kp, (H * D, C), minval=-s_p, maxval=s_p, dtype=jnp.float32)
    bp = jax.random.uniform(kb, (C,), minval=-s_p, maxval=s_p, dtype=jnp.float32)

    # one-time host-side parameter prep (stack QKV, fold 1/sqrt(D) into K,
    # per-head projection layout, bf16 cast)
    w_qkv, wp_heads, bp_f32 = prepare_params(wq, wk, wv, wp_t, bp)

    out = multi_head_attention(x, w_qkv, wp_heads, bp_f32,
                               num_heads=H, head_size=D)
    out = jax.block_until_ready(out)

    ref = _reference(x, wq, wk, wv, wp_t, bp)
    assert out.shape == (B, T, C)
    # bf16 MXU inputs -> looser tolerance vs f32 reference
    assert jnp.allclose(out, ref, atol=5e-2, rtol=5e-2), "mismatch vs reference"

    print("KERNEL_OK")
</pallas_src>

<mosaic_0001>
module attributes {stable_mosaic.version = 11 : i64} {
  func.func @kernel(%arg0: i32, %arg1: memref<2x8x32xbf16, #tpu.memory_space<vmem>>, %arg2: memref<32x96xbf16, #tpu.memory_space<vmem>>, %arg3: memref<4x8x32xbf16, #tpu.memory_space<vmem>>, %arg4: memref<1x32xf32, #tpu.memory_space<vmem>>, %arg5: memref<2x8x32xf32, #tpu.memory_space<vmem>>) attributes {dimension_semantics = [#tpu.dimension_semantics<arbitrary>], iteration_bounds = array<i64: 1>, scalar_prefetch = 0 : i64, scratch_operands = 0 : i64, tpu.core_type = #tpu.core_type<tc>, window_params = [{pipeline_mode = #tpu.pipeline_mode<synchronous>, transform_indices = @transform_0, window_bounds = array<i64: 2, 8, 32>}, {pipeline_mode = #tpu.pipeline_mode<synchronous>, transform_indices = @transform_1, window_bounds = array<i64: 32, 96>}, {pipeline_mode = #tpu.pipeline_mode<synchronous>, transform_indices = @transform_2, window_bounds = array<i64: 4, 8, 32>}, {pipeline_mode = #tpu.pipeline_mode<synchronous>, transform_indices = @transform_3, window_bounds = array<i64: 1, 32>}, {pipeline_mode = #tpu.pipeline_mode<synchronous>, transform_indices = @transform_4, window_bounds = array<i64: 2, 8, 32>}]} {
    %c0 = arith.constant 0 : index
    %c0_0 = arith.constant 0 : index
    %c0_1 = arith.constant 0 : index
    %0 = vector.load %arg1[%c0, %c0_0, %c0_1] : memref<2x8x32xbf16, #tpu.memory_space<vmem>>, vector<2x8x32xbf16>
    %1 = vector.shape_cast %0 : vector<2x8x32xbf16> to vector<16x32xbf16>
    %c0_2 = arith.constant 0 : index
    %c0_3 = arith.constant 0 : index
    %2 = vector.load %arg2[%c0_2, %c0_3] : memref<32x96xbf16, #tpu.memory_space<vmem>>, vector<32x96xbf16>
    %cst = arith.constant dense<0.000000e+00> : vector<16x96xf32>
    %3 = tpu.matmul %1, %2, %cst {dimension_numbers = #tpu.dot_dimension_numbers<[1], [0], [0], [1], [0, 0, 1, 1], [], []>} : vector<16x32xbf16>, vector<32x96xbf16>, vector<16x96xf32> -> vector<16x96xf32>
    %4 = arith.truncf %3 : vector<16x96xf32> to vector<16x96xbf16>
    %5 = tpu.iota {dimensions = array<i32: 0>} : vector<8x8xi32>
    %6 = tpu.iota {dimensions = array<i32: 1>} : vector<8x8xi32>
    %7 = arith.cmpi sle, %6, %5 : vector<8x8xi32>
    %cst_4 = arith.constant 0.000000e+00 : f32
    %cst_5 = arith.constant -1.000000e+30 : f32
    %8 = vector.broadcast %cst_4 : f32 to vector<8x8xf32>
    %9 = vector.broadcast %cst_5 : f32 to vector<8x8xf32>
    %10 = arith.select %7, %8, %9 : vector<8x8xi1>, vector<8x8xf32>
    %cst_6 = arith.constant 0.000000e+00 : f32
    %11 = vector.broadcast %cst_6 : f32 to vector<16x32xf32>
    %12 = vector.extract_strided_slice %4 {offsets = [0, 0], sizes = [16, 8], strides = [1, 1]} : vector<16x96xbf16> to vector<16x8xbf16>
    %13 = vector.shape_cast %12 : vector<16x8xbf16> to vector<2x8x8xbf16>
    %14 = vector.extract_strided_slice %4 {offsets = [0, 32], sizes = [16, 8], strides = [1, 1]} : vector<16x96xbf16> to vector<16x8xbf16>
    %15 = vector.shape_cast %14 : vector<16x8xbf16> to vector<2x8x8xbf16>
    %16 = vector.extract_strided_slice %4 {offsets = [0, 64], sizes = [16, 8], strides = [1, 1]} : vector<16x96xbf16> to vector<16x8xbf16>
    %17 = vector.shape_cast %16 : vector<16x8xbf16> to vector<2x8x8xbf16>
    "tpu.trace_start"() <{level = 10 : i32, message = "bqd,bkd->bqk"}> : () -> ()
    %cst_7 = arith.constant dense<0.000000e+00> : vector<2x8x8xf32>
    %18 = tpu.matmul %13, %15, %cst_7 {dimension_numbers = #tpu.dot_dimension_numbers<[2], [2], [1], [1], [0, 0, 0, 1, 1, 1], [0], [0]>} : vector<2x8x8xbf16>, vector<2x8x8xbf16>, vector<2x8x8xf32> -> vector<2x8x8xf32>
    "tpu.trace_stop"() : () -> ()
    %19 = vector.shape_cast %10 : vector<8x8xf32> to vector<1x8x8xf32>
    %20 = vector.broadcast %19 : vector<1x8x8xf32> to vector<2x8x8xf32>
    %21 = arith.addf %18, %20 : vector<2x8x8xf32>
    %cst_8 = arith.constant dense<0xFF800000> : vector<2x8xf32>
    %22 = vector.multi_reduction <maximumf>, %21, %cst_8 [2] : vector<2x8x8xf32> to vector<2x8xf32>
    %23 = vector.shape_cast %22 : vector<2x8xf32> to vector<2x8x1xf32>
    %24 = vector.broadcast %23 : vector<2x8x1xf32> to vector<2x8x8xf32>
    %25 = arith.subf %21, %24 : vector<2x8x8xf32>
    %26 = math.exp %25 : vector<2x8x8xf32>
    %cst_9 = arith.constant dense<0.000000e+00> : vector<2x8xf32>
    %27 = vector.multi_reduction <add>, %26, %cst_9 [2] : vector<2x8x8xf32> to vector<2x8xf32>
    %28 = vector.shape_cast %27 : vector<2x8xf32> to vector<2x8x1xf32>
    %29 = tpu.reciprocal %28 : vector<2x8x1xf32> -> vector<2x8x1xf32>
    %30 = vector.broadcast %29 : vector<2x8x1xf32> to vector<2x8x8xf32>
    %31 = arith.mulf %26, %30 : vector<2x8x8xf32>
    %32 = arith.truncf %31 : vector<2x8x8xf32> to vector<2x8x8xbf16>
    "tpu.trace_start"() <{level = 10 : i32, message = "bqk,bkd->bqd"}> : () -> ()
    %cst_10 = arith.constant dense<0.000000e+00> : vector<2x8x8xf32>
    %33 = tpu.matmul %32, %17, %cst_10 {dimension_numbers = #tpu.dot_dimension_numbers<[2], [1], [1], [2], [0, 0, 0, 1, 1, 2], [0], [0]>} : vector<2x8x8xbf16>, vector<2x8x8xbf16>, vector<2x8x8xf32> -> vector<2x8x8xf32>
    "tpu.trace_stop"() : () -> ()
    %34 = vector.shape_cast %33 : vector<2x8x8xf32> to vector<16x8xf32>
    %35 = arith.truncf %34 : vector<16x8xf32> to vector<16x8xbf16>
    %c0_11 = arith.constant 0 : index
    %c0_12 = arith.constant 0 : index
    %c0_13 = arith.constant 0 : index
    %36 = vector.load %arg3[%c0_11, %c0_12, %c0_13] : memref<4x8x32xbf16, #tpu.memory_space<vmem>>, vector<1x8x32xbf16>
    %37 = vector.shape_cast %36 : vector<1x8x32xbf16> to vector<8x32xbf16>
    %cst_14 = arith.constant dense<0.000000e+00> : vector<16x32xf32>
    %38 = tpu.matmul %35, %37, %cst_14 {dimension_numbers = #tpu.dot_dimension_numbers<[1], [0], [0], [1], [0, 0, 1, 1], [], []>} : vector<16x8xbf16>, vector<8x32xbf16>, vector<16x32xf32> -> vector<16x32xf32>
    %39 = arith.addf %11, %38 : vector<16x32xf32>
    %40 = vector.extract_strided_slice %4 {offsets = [0, 8], sizes = [16, 8], strides = [1, 1]} : vector<16x96xbf16> to vector<16x8xbf16>
    %41 = vector.shape_cast %40 : vector<16x8xbf16> to vector<2x8x8xbf16>
    %42 = vector.extract_strided_slice %4 {offsets = [0, 40], sizes = [16, 8], strides = [1, 1]} : vector<16x96xbf16> to vector<16x8xbf16>
    %43 = vector.shape_cast %42 : vector<16x8xbf16> to vector<2x8x8xbf16>
    %44 = vector.extract_strided_slice %4 {offsets = [0, 72], sizes = [16, 8], strides = [1, 1]} : vector<16x96xbf16> to vector<16x8xbf16>
    %45 = vector.shape_cast %44 : vector<16x8xbf16> to vector<2x8x8xbf16>
    "tpu.trace_start"() <{level = 10 : i32, message = "bqd,bkd->bqk"}> : () -> ()
    %cst_15 = arith.constant dense<0.000000e+00> : vector<2x8x8xf32>
    %46 = tpu.matmul %41, %43, %cst_15 {dimension_numbers = #tpu.dot_dimension_numbers<[2], [2], [1], [1], [0, 0, 0, 1, 1, 1], [0], [0]>} : vector<2x8x8xbf16>, vector<2x8x8xbf16>, vector<2x8x8xf32> -> vector<2x8x8xf32>
    "tpu.trace_stop"() : () -> ()
    %47 = vector.shape_cast %10 : vector<8x8xf32> to vector<1x8x8xf32>
    %48 = vector.broadcast %47 : vector<1x8x8xf32> to vector<2x8x8xf32>
    %49 = arith.addf %46, %48 : vector<2x8x8xf32>
    %cst_16 = arith.constant dense<0xFF800000> : vector<2x8xf32>
    %50 = vector.multi_reduction <maximumf>, %49, %cst_16 [2] : vector<2x8x8xf32> to vector<2x8xf32>
    %51 = vector.shape_cast %50 : vector<2x8xf32> to vector<2x8x1xf32>
    %52 = vector.broadcast %51 : vector<2x8x1xf32> to vector<2x8x8xf32>
    %53 = arith.subf %49, %52 : vector<2x8x8xf32>
    %54 = math.exp %53 : vector<2x8x8xf32>
    %cst_17 = arith.constant dense<0.000000e+00> : vector<2x8xf32>
    %55 = vector.multi_reduction <add>, %54, %cst_17 [2] : vector<2x8x8xf32> to vector<2x8xf32>
    %56 = vector.shape_cast %55 : vector<2x8xf32> to vector<2x8x1xf32>
    %57 = tpu.reciprocal %56 : vector<2x8x1xf32> -> vector<2x8x1xf32>
    %58 = vector.broadcast %57 : vector<2x8x1xf32> to vector<2x8x8xf32>
    %59 = arith.mulf %54, %58 : vector<2x8x8xf32>
    %60 = arith.truncf %59 : vector<2x8x8xf32> to vector<2x8x8xbf16>
    "tpu.trace_start"() <{level = 10 : i32, message = "bqk,bkd->bqd"}> : () -> ()
    %cst_18 = arith.constant dense<0.000000e+00> : vector<2x8x8xf32>
    %61 = tpu.matmul %60, %45, %cst_18 {dimension_numbers = #tpu.dot_dimension_numbers<[2], [1], [1], [2], [0, 0, 0, 1, 1, 2], [0], [0]>} : vector<2x8x8xbf16>, vector<2x8x8xbf16>, vector<2x8x8xf32> -> vector<2x8x8xf32>
    "tpu.trace_stop"() : () -> ()
    %62 = vector.shape_cast %61 : vector<2x8x8xf32> to vector<16x8xf32>
    %63 = arith.truncf %62 : vector<16x8xf32> to vector<16x8xbf16>
    %c1 = arith.constant 1 : index
    %c0_19 = arith.constant 0 : index
    %c0_20 = arith.constant 0 : index
    %64 = vector.load %arg3[%c1, %c0_19, %c0_20] : memref<4x8x32xbf16, #tpu.memory_space<vmem>>, vector<1x8x32xbf16>
    %65 = vector.shape_cast %64 : vector<1x8x32xbf16> to vector<8x32xbf16>
    %cst_21 = arith.constant dense<0.000000e+00> : vector<16x32xf32>
    %66 = tpu.matmul %63, %65, %cst_21 {dimension_numbers = #tpu.dot_dimension_numbers<[1], [0], [0], [1], [0, 0, 1, 1], [], []>} : vector<16x8xbf16>, vector<8x32xbf16>, vector<16x32xf32> -> vector<16x32xf32>
    %67 = arith.addf %39, %66 : vector<16x32xf32>
    %68 = vector.extract_strided_slice %4 {offsets = [0, 16], sizes = [16, 8], strides = [1, 1]} : vector<16x96xbf16> to vector<16x8xbf16>
    %69 = vector.shape_cast %68 : vector<16x8xbf16> to vector<2x8x8xbf16>
    %70 = vector.extract_strided_slice %4 {offsets = [0, 48], sizes = [16, 8], strides = [1, 1]} : vector<16x96xbf16> to vector<16x8xbf16>
    %71 = vector.shape_cast %70 : vector<16x8xbf16> to vector<2x8x8xbf16>
    %72 = vector.extract_strided_slice %4 {offsets = [0, 80], sizes = [16, 8], strides = [1, 1]} : vector<16x96xbf16> to vector<16x8xbf16>
    %73 = vector.shape_cast %72 : vector<16x8xbf16> to vector<2x8x8xbf16>
    "tpu.trace_start"() <{level = 10 : i32, message = "bqd,bkd->bqk"}> : () -> ()
    %cst_22 = arith.constant dense<0.000000e+00> : vector<2x8x8xf32>
    %74 = tpu.matmul %69, %71, %cst_22 {dimension_numbers = #tpu.dot_dimension_numbers<[2], [2], [1], [1], [0, 0, 0, 1, 1, 1], [0], [0]>} : vector<2x8x8xbf16>, vector<2x8x8xbf16>, vector<2x8x8xf32> -> vector<2x8x8xf32>
    "tpu.trace_stop"() : () -> ()
    %75 = vector.shape_cast %10 : vector<8x8xf32> to vector<1x8x8xf32>
    %76 = vector.broadcast %75 : vector<1x8x8xf32> to vector<2x8x8xf32>
    %77 = arith.addf %74, %76 : vector<2x8x8xf32>
    %cst_23 = arith.constant dense<0xFF800000> : vector<2x8xf32>
    %78 = vector.multi_reduction <maximumf>, %77, %cst_23 [2] : vector<2x8x8xf32> to vector<2x8xf32>
    %79 = vector.shape_cast %78 : vector<2x8xf32> to vector<2x8x1xf32>
    %80 = vector.broadcast %79 : vector<2x8x1xf32> to vector<2x8x8xf32>
    %81 = arith.subf %77, %80 : vector<2x8x8xf32>
    %82 = math.exp %81 : vector<2x8x8xf32>
    %cst_24 = arith.constant dense<0.000000e+00> : vector<2x8xf32>
    %83 = vector.multi_reduction <add>, %82, %cst_24 [2] : vector<2x8x8xf32> to vector<2x8xf32>
    %84 = vector.shape_cast %83 : vector<2x8xf32> to vector<2x8x1xf32>
    %85 = tpu.reciprocal %84 : vector<2x8x1xf32> -> vector<2x8x1xf32>
    %86 = vector.broadcast %85 : vector<2x8x1xf32> to vector<2x8x8xf32>
    %87 = arith.mulf %82, %86 : vector<2x8x8xf32>
    %88 = arith.truncf %87 : vector<2x8x8xf32> to vector<2x8x8xbf16>
    "tpu.trace_start"() <{level = 10 : i32, message = "bqk,bkd->bqd"}> : () -> ()
    %cst_25 = arith.constant dense<0.000000e+00> : vector<2x8x8xf32>
    %89 = tpu.matmul %88, %73, %cst_25 {dimension_numbers = #tpu.dot_dimension_numbers<[2], [1], [1], [2], [0, 0, 0, 1, 1, 2], [0], [0]>} : vector<2x8x8xbf16>, vector<2x8x8xbf16>, vector<2x8x8xf32> -> vector<2x8x8xf32>
    "tpu.trace_stop"() : () -> ()
    %90 = vector.shape_cast %89 : vector<2x8x8xf32> to vector<16x8xf32>
    %91 = arith.truncf %90 : vector<16x8xf32> to vector<16x8xbf16>
    %c2 = arith.constant 2 : index
    %c0_26 = arith.constant 0 : index
    %c0_27 = arith.constant 0 : index
    %92 = vector.load %arg3[%c2, %c0_26, %c0_27] : memref<4x8x32xbf16, #tpu.memory_space<vmem>>, vector<1x8x32xbf16>
    %93 = vector.shape_cast %92 : vector<1x8x32xbf16> to vector<8x32xbf16>
    %cst_28 = arith.constant dense<0.000000e+00> : vector<16x32xf32>
    %94 = tpu.matmul %91, %93, %cst_28 {dimension_numbers = #tpu.dot_dimension_numbers<[1], [0], [0], [1], [0, 0, 1, 1], [], []>} : vector<16x8xbf16>, vector<8x32xbf16>, vector<16x32xf32> -> vector<16x32xf32>
    %95 = arith.addf %67, %94 : vector<16x32xf32>
    %96 = vector.extract_strided_slice %4 {offsets = [0, 24], sizes = [16, 8], strides = [1, 1]} : vector<16x96xbf16> to vector<16x8xbf16>
    %97 = vector.shape_cast %96 : vector<16x8xbf16> to vector<2x8x8xbf16>
    %98 = vector.extract_strided_slice %4 {offsets = [0, 56], sizes = [16, 8], strides = [1, 1]} : vector<16x96xbf16> to vector<16x8xbf16>
    %99 = vector.shape_cast %98 : vector<16x8xbf16> to vector<2x8x8xbf16>
    %100 = vector.extract_strided_slice %4 {offsets = [0, 88], sizes = [16, 8], strides = [1, 1]} : vector<16x96xbf16> to vector<16x8xbf16>
    %101 = vector.shape_cast %100 : vector<16x8xbf16> to vector<2x8x8xbf16>
    "tpu.trace_start"() <{level = 10 : i32, message = "bqd,bkd->bqk"}> : () -> ()
    %cst_29 = arith.constant dense<0.000000e+00> : vector<2x8x8xf32>
    %102 = tpu.matmul %97, %99, %cst_29 {dimension_numbers = #tpu.dot_dimension_numbers<[2], [2], [1], [1], [0, 0, 0, 1, 1, 1], [0], [0]>} : vector<2x8x8xbf16>, vector<2x8x8xbf16>, vector<2x8x8xf32> -> vector<2x8x8xf32>
    "tpu.trace_stop"() : () -> ()
    %103 = vector.shape_cast %10 : vector<8x8xf32> to vector<1x8x8xf32>
    %104 = vector.broadcast %103 : vector<1x8x8xf32> to vector<2x8x8xf32>
    %105 = arith.addf %102, %104 : vector<2x8x8xf32>
    %cst_30 = arith.constant dense<0xFF800000> : vector<2x8xf32>
    %106 = vector.multi_reduction <maximumf>, %105, %cst_30 [2] : vector<2x8x8xf32> to vector<2x8xf32>
    %107 = vector.shape_cast %106 : vector<2x8xf32> to vector<2x8x1xf32>
    %108 = vector.broadcast %107 : vector<2x8x1xf32> to vector<2x8x8xf32>
    %109 = arith.subf %105, %108 : vector<2x8x8xf32>
    %110 = math.exp %109 : vector<2x8x8xf32>
    %cst_31 = arith.constant dense<0.000000e+00> : vector<2x8xf32>
    %111 = vector.multi_reduction <add>, %110, %cst_31 [2] : vector<2x8x8xf32> to vector<2x8xf32>
    %112 = vector.shape_cast %111 : vector<2x8xf32> to vector<2x8x1xf32>
    %113 = tpu.reciprocal %112 : vector<2x8x1xf32> -> vector<2x8x1xf32>
    %114 = vector.broadcast %113 : vector<2x8x1xf32> to vector<2x8x8xf32>
    %115 = arith.mulf %110, %114 : vector<2x8x8xf32>
    %116 = arith.truncf %115 : vector<2x8x8xf32> to vector<2x8x8xbf16>
    "tpu.trace_start"() <{level = 10 : i32, message = "bqk,bkd->bqd"}> : () -> ()
    %cst_32 = arith.constant dense<0.000000e+00> : vector<2x8x8xf32>
    %117 = tpu.matmul %116, %101, %cst_32 {dimension_numbers = #tpu.dot_dimension_numbers<[2], [1], [1], [2], [0, 0, 0, 1, 1, 2], [0], [0]>} : vector<2x8x8xbf16>, vector<2x8x8xbf16>, vector<2x8x8xf32> -> vector<2x8x8xf32>
    "tpu.trace_stop"() : () -> ()
    %118 = vector.shape_cast %117 : vector<2x8x8xf32> to vector<16x8xf32>
    %119 = arith.truncf %118 : vector<16x8xf32> to vector<16x8xbf16>
    %c3 = arith.constant 3 : index
    %c0_33 = arith.constant 0 : index
    %c0_34 = arith.constant 0 : index
    %120 = vector.load %arg3[%c3, %c0_33, %c0_34] : memref<4x8x32xbf16, #tpu.memory_space<vmem>>, vector<1x8x32xbf16>
    %121 = vector.shape_cast %120 : vector<1x8x32xbf16> to vector<8x32xbf16>
    %cst_35 = arith.constant dense<0.000000e+00> : vector<16x32xf32>
    %122 = tpu.matmul %119, %121, %cst_35 {dimension_numbers = #tpu.dot_dimension_numbers<[1], [0], [0], [1], [0, 0, 1, 1], [], []>} : vector<16x8xbf16>, vector<8x32xbf16>, vector<16x32xf32> -> vector<16x32xf32>
    %123 = arith.addf %95, %122 : vector<16x32xf32>
    %c0_36 = arith.constant 0 : index
    %c0_37 = arith.constant 0 : index
    %124 = vector.load %arg4[%c0_36, %c0_37] : memref<1x32xf32, #tpu.memory_space<vmem>>, vector<1x32xf32>
    %125 = vector.broadcast %124 : vector<1x32xf32> to vector<16x32xf32>
    %126 = arith.addf %123, %125 : vector<16x32xf32>
    %127 = vector.shape_cast %126 : vector<16x32xf32> to vector<2x8x32xf32>
    %c0_38 = arith.constant 0 : index
    %c0_39 = arith.constant 0 : index
    %c0_40 = arith.constant 0 : index
    %128 = vector.load %arg5[%c0_38, %c0_39, %c0_40] : memref<2x8x32xf32, #tpu.memory_space<vmem>>, vector<2x8x32xf32>
    tpu.vector_store %arg5[%c0_38, %c0_39, %c0_40], %127 {strides = array<i32>} : memref<2x8x32xf32, #tpu.memory_space<vmem>>, vector<2x8x32xf32>,
    return
  }
  func.func @transform_0(%arg0: i32) -> (i32, i32, i32) {
    %c0_i32 = arith.constant 0 : i32
    %c0_i32_0 = arith.constant 0 : i32
    %c0_i32_1 = arith.constant 0 : i32
    %c0_i32_2 = arith.constant 0 : i32
    return %c0_i32, %c0_i32_0, %c0_i32_1 : i32, i32, i32
  }
  func.func @transform_1(%arg0: i32) -> (i32, i32) {
    %c0_i32 = arith.constant 0 : i32
    %c0_i32_0 = arith.constant 0 : i32
    %c0_i32_1 = arith.constant 0 : i32
    return %c0_i32, %c0_i32_0 : i32, i32
  }
  func.func @transform_2(%arg0: i32) -> (i32, i32, i32) {
    %c0_i32 = arith.constant 0 : i32
    %c0_i32_0 = arith.constant 0 : i32
    %c0_i32_1 = arith.constant 0 : i32
    %c0_i32_2 = arith.constant 0 : i32
    return %c0_i32, %c0_i32_0, %c0_i32_1 : i32, i32, i32
  }
  func.func @transform_3(%arg0: i32) -> (i32, i32) {
    %c0_i32 = arith.constant 0 : i32
    %c0_i32_0 = arith.constant 0 : i32
    %c0_i32_1 = arith.constant 0 : i32
    return %c0_i32, %c0_i32_0 : i32, i32
  }
  func.func @transform_4(%arg0: i32) -> (i32, i32, i32) {
    %c0_i32 = arith.constant 0 : i32
    %c0_i32_0 = arith.constant 0 : i32
    %c0_i32_1 = arith.constant 0 : i32
    %c0_i32_2 = arith.constant 0 : i32
    return %c0_i32, %c0_i32_0, %c0_i32_1 : i32, i32, i32
  }
}

</mosaic_0001>

<bundles_post_ra>
// kernel: tpu_custom_call.1
= control target key start
LH: loop header
LB: loop body
LE: loop exit
PB: predicated region body
PF: predicated region fallthrough
CT: control target
= control target key end

     0   :  { %9 = vsyncpa [#allocation3], 0  ;;  %s1179_s0 = inlined_call_operand.hbm [shape: bf16[2,8,32], index: 0, kind: input, shape index: {}]   ;;  %s1180_s1 = inlined_call_operand.hbm [shape: bf16[32,96], index: 1, kind: input, shape index: {}]   ;;  %s1181_s2 = inlined_call_operand.hbm [shape: bf16[4,8,32], index: 2, kind: input, shape index: {}]   ;;  %s1182_s3 = inlined_call_operand.vmem [shape: f32[1,32], index: 3, kind: input, shape index: {}]   ;;  %s1183_s4 = inlined_call_operand.hbm [shape: f32[2,8,32], index: 4, kind: output, shape index: {}]  }
   0x1   :  { %10 = vsyncpa [#allocation6], 0 }
   0x2   :  { %11 = vsyncpa [#allocation4], 0  ;;  %s29_s17 = sshll.u32 %s1180_s1, 4  ;;  %s984_s18 = smov [#allocation5]   ;;  %s30_s17 = int_to_ptr.hbm [resolvable:$true] %s29_s17 }
   0x3   :  { %s31_s19 = sshll.u32 %s984_s18, 4  ;;  %s16_s22 = sshll.u32 %s1179_s0, 4  ;;  %s32_s19 = int_to_ptr.vmem [resolvable:$true] %s31_s19  ;;  %s17_s22 = int_to_ptr.hbm [resolvable:$true] %s16_s22 }
   0x4   :  { %s985_s23 = smov 64   ;;  %s986_s24 = smov 4  }
   0x5   :  { %37 = dma.hbm_to_vmem [thread:$0]  %s30_s17, 256, %s32_s19, [#allocation6], %s985_s23, %s985_s23, %s986_s24  }
   0x6   :  { %s987_s25 = smov [#allocation2]   ;;  %s42_s1 = sshll.u32 %s1181_s2, 4  ;;  %s43_s1 = int_to_ptr.hbm [resolvable:$true] %s42_s1 }
   0x7   :  { %s18_s26 = sshll.u32 %s987_s25, 4  ;;  %s988_s29 = smov [#allocation7]   ;;  %s19_s26 = int_to_ptr.vmem [resolvable:$true] %s18_s26 }
   0x8   :  { %24 = dma.hbm_to_vmem [thread:$0]  %s17_s22, 128, %s19_s26, [#allocation3], %s985_s23, %s985_s23, %s986_s24  }
   0x9   :  { %s44_s30 = sshll.u32 %s988_s29, 4  ;;  %s45_s30 = int_to_ptr.vmem [resolvable:$true] %s44_s30 }
   0xa   :  { %50 = dma.hbm_to_vmem [thread:$0]  %s43_s1, 256, %s45_s30, [#allocation6], %s985_s23, %s985_s23, %s986_s24  }
   0xb   :  { %978 = dma.done.wait [#allocation3], 128  }
   0xc   :  { %979 = vsyncadd [#allocation3], 4294967168 }
   0xd   :  { %980 = dma.done.wait [#allocation6], 512  }
   0xe   :  { %981 = vsyncadd [#allocation6], 4294966784  ;;  %v829_v0 = vld [vmem:[#allocation5 + $0x8] sm:$0xff]  ;;  %v828_v1 = vld [vmem:[#allocation5] sm:$0xff]  ;;  %vm89_vm0 = vcmask 261120   ;;  %s989_s0 = smov 96   ;;  %v109_v23 = vlaneseq }
   0xf   :  { %99 = vmatpush.bf16.msra.mxu0 %v829_v0  ;;  %v827_v2 = vld [vmem:[#allocation2] sm:$0xff]  ;;  %s990_s2 = smov 88   ;;  %s991_s5 = smov 120   ;;  %vm120_vm1 = vcmask 64512   ;;  %vm219_vm2 = vcmask 1043456  }
  0x10   :  { %s992_s6 = smov 56   ;;  %v110_v24 = vshrl.u32 %v109_v23, 7  ;;  %v112_v25 = vand.u32 127, %v109_v23  ;;  %v993_v26 = vmov -1e+30   ;;  %s994_s7 = smov 80  }
  0x11   :  { %s995_s8 = smov 112   ;;  %s996_s9 = smov 48  }
  0x12   :  { %vm113_vm3 = vcmp.le.s32.totalorder %v112_v25, %v110_v24  ;;  %s997_s10 = smov 72   ;;  %s998_s11 = smov 104  }
  0x13   :  { %100 = vmatpush.bf16.msra.mxu0 %v828_v1  ;;  %v1065_v27 = vsel %vm113_vm3, 0.0, %v993_v26  ;;  %s999_s12 = smov 40   ;;  %s1000_s15 = smov [#allocation8]  }
  0x14   :  { %s778_s16 = sshll.u32 %s1000_s15, 4  ;;  %s780_s19 = sshll.u32 %s1183_s4, 4  ;;  %s779_s16 = int_to_ptr.vmem [resolvable:$true] %s778_s16  ;;  %s781_s19 = int_to_ptr.hbm [resolvable:$true] %s780_s19 }
  0x15   :  { %s1002_s20 = smov 8  }
  0x16   :  { %806 = vmatmul.msk.bf16.vlgmr.msra.gmra.mxu0 %vm89_vm0, %v827_v2 }
  0x93   :  { %v102_v3 = vpop.f32.mrf.mxu0 }
  0x94   :  { %v107_v4 = vpack.c.bf16 %v102_v3, %v102_v3 }
  0x96   :  { %v116_v5 = vunpack.c.l.b16 %v107_v4 }
  0x98   :  { %v1044_v6 = vpack.c.b16 %v116_v5, %v116_v5 }
  0x9a   :  { %118 = vrot.lane.b32.xlu1 %v1044_v6, %s989_s0  ;;  %261 = vrot.lane.b32.xlu0 %v1044_v6, %s990_s2 }
  0x9b   :  { %v104_v7 = vpop.f32.mrf.mxu0 }
  0x9c   :  { %v108_v8 = vpack.c.bf16 %v104_v7, %v104_v7 }
  0x9e   :  { %v141_v9 = vunpack.c.l.b16 %v108_v8 }
  0xa0   :  { %v1048_v10 = vpack.c.b16 %v141_v9, %v141_v9 }
  0xa2   :  { %259 = vrot.lane.b32.xlu0 %v1044_v6, %s991_s5  ;;  %284 = vrot.lane.b32.xlu2 %v1048_v10, %s990_s2 }
  0xa3   :  { %143 = vrot.lane.b32.xlu1 %v1048_v10, %s989_s0 }
  0xaa   :  { %282 = vrot.lane.b32.xlu2 %v1048_v10, %s991_s5 }
  0xb2   :  { %355 = vrot.lane.b32.xlu2 %v1044_v6, %s992_s6 }
  0xfc   :  { %v285_v11 = vpop.permute.xlu2 %284 }
  0xfd   :  { %v290_v17 = vsel %vm120_vm1, %v285_v11, 0 }
 0x104   :  { %v283_v12 = vpop.permute.xlu2 %282 }
 0x10c   :  { %v119_v13 = vpop.permute.xlu1 %118  ;;  %v262_v14 = vpop.permute.xlu0 %261 }
 0x10d   :  { %v125_v15 = vsel %vm120_vm1, %v119_v13, 0  ;;  %v267_v16 = vsel %vm120_vm1, %v262_v14, 0  ;;  %v356_v18 = vpop.permute.xlu2 %355 }
 0x10e   :  { %134 = vmatpush.bf16.xpose.msra.mxu1 %v125_v15  ;;  %276 = vmatpush.bf16.xpose.msrb.mxu0 %v267_v16  ;;  %v361_v22 = vsel %vm219_vm2, %v356_v18, 0 }
 0x114   :  { %v260_v19 = vpop.permute.xlu0 %259 }
 0x115   :  { %v144_v20 = vpop.permute.xlu1 %143  ;;  %807 = vmatmul.msk.bf16.vlgmr.msra.gmra.mxu1 %vm120_vm1, %v107_v4  ;;  %811 = vmatmul.msk.bf16.vlgmr.msrb.gmra.mxu0 %vm120_vm1, %v260_v19  ;;  %v399_v4 = vld [vmem:[#allocation7 + $0x4] sm:$0xf] }
 0x116   :  { %299 = vmatpush.bf16.xpose.msrb.mxu1 %v290_v17  ;;  %v149_v21 = vsel %vm120_vm1, %v144_v20, 0  ;;  %v404_v7 = vsel %vm219_vm2, %v399_v4, 0 }
 0x117   :  { %158 = vmatpush.bf16.xpose.msra.mxu2 %v149_v21  ;;  %413 = vmatpush.bf16.msra.mxu0 %v404_v7 }
 0x11e   :  { %808 = vmatmul.msk.bf16.vlgmr.msra.gmra.mxu2 %vm120_vm1, %v108_v8 }
 0x11f   :  { %370 = vmatpush.bf16.msrb.mxu2 %v361_v22 }
 0x125   :  { %812 = vmatmul.msk.bf16.vlgmr.msrb.gmra.mxu1 %vm120_vm1, %v283_v12 }
 0x192   :  { %v136_v28 = vpop.f32.mrf.mxu1  ;;  %v278_v29 = vpop.f32.mrf.mxu0 }
 0x193   :  { %v137_v30 = vadd.f32 %v136_v28, %v1065_v27  ;;  %v279_v31 = vadd.f32 %v278_v29, %v1065_v27 }
 0x195   :  { %v305_v32 = vsel %vm120_vm1, %v279_v31, -inf  ;;  %v164_v33 = vsel %vm120_vm1, %v137_v30, -inf }
 0x196   :  { %306 = vmax.xlane.f32.xlu0 %v305_v32  ;;  %165 = vmax.xlane.f32.xlu2 %v164_v33 }
 0x19a   :  { %v138_v34 = vpop.f32.mrf.mxu1  ;;  %v280_v35 = vpop.f32.mrf.mxu0 }
 0x1a1   :  { %v160_v36 = vpop.f32.mrf.mxu2 }
 0x1a2   :  { %v161_v37 = vadd.f32 %v160_v36, %v1065_v27  ;;  %v301_v38 = vpop.f32.mrf.mxu1 }
 0x1a3   :  { %v302_v40 = vadd.f32 %v301_v38, %v1065_v27 }
 0x1a4   :  { %v167_v39 = vsel %vm120_vm1, %v161_v37, -inf }
 0x1a5   :  { %168 = vmax.xlane.f32.xlu2 %v167_v39  ;;  %v308_v43 = vsel %vm120_vm1, %v302_v40, -inf }
 0x1a9   :  { %v162_v41 = vpop.f32.mrf.mxu2 }
 0x1aa   :  { %442 = vrot.lane.b32.xlu0 %v1044_v6, %s994_s7  ;;  %v303_v42 = vpop.f32.mrf.mxu1 }
 0x1ad   :  { %309 = vmax.xlane.f32.xlu2 %v308_v43 }
 0x209   :  { %v307_v44 = vpop.xlane.xlu0 %306  ;;  %v166_v45 = vpop.xlane.xlu2 %165 }
 0x20a   :  { %v311_v46 = vsub.f32 %v279_v31, %v307_v44  ;;  %v170_v47 = vsub.f32 %v137_v30, %v166_v45 }
 0x20c   :  { %v313_v48 = vmul.f32 1.442695, %v311_v46  ;;  %v172_v49 = vmul.f32 1.442695, %v170_v47 }
 0x20e   :  { %850 = vpow2.f32 %v313_v48 }
 0x20f   :  { %852 = vpow2.f32 %v172_v49 }
 0x214   :  { %v1077_v50 = vpop.eup %850 }
 0x215   :  { %v1079_v51 = vpop.eup %852  ;;  %v317_v52 = vsel %vm120_vm1, %v1077_v50, 0.0 }
 0x216   :  { %v176_v53 = vsel %vm120_vm1, %v1079_v51, 0.0  ;;  %318 = vadd.xlane.f32.xlu1 %v317_v52 }
 0x217   :  { %177 = vadd.xlane.f32.xlu0 %v176_v53 }
 0x218   :  { %v169_v54 = vpop.xlane.xlu2 %168 }
 0x219   :  { %v171_v55 = vsub.f32 %v161_v37, %v169_v54 }
 0x21b   :  { %v174_v56 = vmul.f32 1.442695, %v171_v55 }
 0x21c   :  { %v443_v57 = vpop.permute.xlu0 %442 }
 0x21d   :  { %854 = vpow2.f32 %v174_v56  ;;  %v448_v58 = vsel %vm120_vm1, %v443_v57, 0 }
 0x21e   :  { %457 = vmatpush.bf16.xpose.msra.mxu2 %v448_v58 }
 0x220   :  { %v310_v59 = vpop.xlane.xlu2 %309 }
 0x221   :  { %v312_v60 = vsub.f32 %v302_v40, %v310_v59 }
 0x223   :  { %v1086_v61 = vpop.eup %854  ;;  %v315_v62 = vmul.f32 1.442695, %v312_v60 }
 0x224   :  { %v179_v63 = vsel %vm120_vm1, %v1086_v61, 0.0 }
 0x225   :  { %856 = vpow2.f32 %v315_v62  ;;  %180 = vadd.xlane.f32.xlu2 %v179_v63 }
 0x22b   :  { %v1090_v0 = vpop.eup %856 }
 0x22c   :  { %v320_v1 = vsel %vm120_vm1, %v1090_v0, 0.0 }
 0x22d   :  { %321 = vadd.xlane.f32.xlu2 %v320_v1 }
 0x22f   :  { %440 = vrot.lane.b32.xlu1 %v1044_v6, %s995_s8 }
 0x237   :  { %214 = vrot.lane.b32.xlu1 %v1044_v6, %s985_s23 }
 0x23f   :  { %236 = vrot.lane.b32.xlu1 %v1048_v10, %s985_s23 }
 0x245   :  { %376 = vrot.lane.b32.xlu2 %v1048_v10, %s992_s6 }
 0x247   :  { %465 = vrot.lane.b32.xlu1 %v1048_v10, %s994_s7 }
 0x24d   :  { %536 = vrot.lane.b32.xlu2 %v1044_v6, %s996_s9 }
 0x24f   :  { %463 = vrot.lane.b32.xlu1 %v1048_v10, %s995_s8 }
 0x255   :  { %628 = vrot.lane.b32.xlu2 %v1048_v10, %s997_s10 }
 0x25d   :  { %603 = vrot.lane.b32.xlu2 %v1044_v6, %s998_s11 }
 0x265   :  { %626 = vrot.lane.b32.xlu2 %v1048_v10, %s998_s11 }
 0x289   :  { %v319_v2 = vpop.xlane.xlu1 %318 }
 0x28a   :  { %v178_v3 = vpop.xlane.xlu0 %177  ;;  %858 = vrcp.f32 %v319_v2  ;;  %v334_v14 = vand.u32 2147483648, %v319_v2  ;;  %v332_v16 = vand.u32 2147483647, %v319_v2  ;;  %vm328_vm5 = vweird.f32 %v319_v2 }
 0x28b   :  { %860 = vrcp.f32 %v178_v3  ;;  %v193_v28 = vand.u32 2147483648, %v178_v3  ;;  %vm187_vm9 = vweird.f32 %v178_v3  ;;  %v191_v30 = vand.u32 2147483647, %v178_v3 }
 0x28c   :  { %v335_v19 = vor.u32 1.1754944e-38, %v334_v14  ;;  %vm333_vm7 = vcmp.eq.f32.partialorder %v332_v16, 8.507059e+37 }
 0x28d   :  { %v194_v34 = vor.u32 1.1754944e-38, %v193_v28  ;;  %vm192_vm11 = vcmp.eq.f32.partialorder %v191_v30, 8.507059e+37 }
 0x290   :  { %v859_v5 = vpop.eup %858 }
 0x291   :  { %v861_v8 = vpop.eup %860  ;;  %v324_v9 = vmul.f32 %v859_v5, %v319_v2  ;;  %vm329_vm4 = vweird.f32 %v859_v5 }
 0x292   :  { %v183_v11 = vmul.f32 %v861_v8, %v178_v3  ;;  %vm330_vm6 = vmor %vm328_vm5, %vm329_vm4  ;;  %vm188_vm8 = vweird.f32 %v861_v8 }
 0x293   :  { %v325_v12 = vsub.f32 1.0, %v324_v9  ;;  %vm189_vm10 = vmor %vm187_vm9, %vm188_vm8  ;;  %v258_v9 = vld [vmem:[#allocation7] sm:$0xf] }
 0x294   :  { %v184_v15 = vsub.f32 1.0, %v183_v11  ;;  %v424_v11 = vsel %vm219_vm2, %v258_v9, 0 }
 0x295   :  { %v326_v13 = vmul.f32 %v859_v5, %v325_v12  ;;  %433 = vmatpush.bf16.msra.mxu1 %v424_v11 }
 0x296   :  { %v185_v20 = vmul.f32 %v861_v8, %v184_v15 }
 0x297   :  { %v327_v17 = vadd.f32 %v859_v5, %v326_v13 }
 0x298   :  { %v181_v18 = vpop.xlane.xlu2 %180  ;;  %v186_v25 = vadd.f32 %v861_v8, %v185_v20 }
 0x299   :  { %862 = vrcp.f32 %v181_v18  ;;  %v331_v21 = vsel %vm330_vm6, %v859_v5, %v327_v17  ;;  %v207_v45 = vand.u32 2147483648, %v181_v18  ;;  %vm201_vm13 = vweird.f32 %v181_v18 }
 0x29a   :  { %v336_v22 = vsel %vm333_vm7, %v335_v19, %v331_v21  ;;  %v190_v33 = vsel %vm189_vm10, %v861_v8, %v186_v25  ;;  %v205_v46 = vand.u32 2147483647, %v181_v18 }
 0x29b   :  { %v351_v23 = vmul.f32 %v1077_v50, %v336_v22  ;;  %v195_v35 = vsel %vm192_vm11, %v194_v34, %v190_v33  ;;  %v208_v53 = vor.u32 1.1754944e-38, %v207_v45 }
 0x29c   :  { %v210_v38 = vmul.f32 %v1079_v51, %v195_v35  ;;  %vm206_vm15 = vcmp.eq.f32.partialorder %v205_v46, 8.507059e+37 }
 0x29d   :  { %v353_v24 = vpack.c.bf16 %v351_v23, %v351_v23 }
 0x29e   :  { %v212_v42 = vpack.c.bf16 %v210_v38, %v210_v38 }
 0x29f   :  { %v863_v26 = vpop.eup %862  ;;  %813 = vmatmul.msk.bf16.vlgmr.msrb.gmra.mxu2 %vm120_vm1, %v353_v24 }
 0x2a0   :  { %v322_v29 = vpop.xlane.xlu2 %321  ;;  %v197_v32 = vmul.f32 %v863_v26, %v181_v18  ;;  %vm202_vm12 = vweird.f32 %v863_v26 }
 0x2a1   :  { %v441_v31 = vpop.permute.xlu1 %440  ;;  %864 = vrcp.f32 %v322_v29  ;;  %vm203_vm14 = vmor %vm201_vm13, %vm202_vm12  ;;  %v348_v1 = vand.u32 2147483648, %v322_v29  ;;  %vm342_vm4 = vweird.f32 %v322_v29  ;;  %v346_v2 = vand.u32 2147483647, %v322_v29 }
 0x2a2   :  { %v198_v36 = vsub.f32 1.0, %v197_v32 }
 0x2a3   :  { %v349_v4 = vor.u32 1.1754944e-38, %v348_v1  ;;  %vm347_vm6 = vcmp.eq.f32.partialorder %v346_v2, 8.507059e+37 }
 0x2a4   :  { %v199_v40 = vmul.f32 %v863_v26, %v198_v36 }
 0x2a6   :  { %v200_v43 = vadd.f32 %v863_v26, %v199_v40 }
 0x2a7   :  { %v865_v44 = vpop.eup %864 }
 0x2a8   :  { %v377_v37 = vpop.permute.xlu2 %376  ;;  %v338_v50 = vmul.f32 %v865_v44, %v322_v29  ;;  %v204_v52 = vsel %vm203_vm14, %v863_v26, %v200_v43  ;;  %vm343_vm3 = vweird.f32 %v865_v44 }
 0x2a9   :  { %v215_v39 = vpop.permute.xlu1 %214  ;;  %v382_v54 = vsel %vm219_vm2, %v377_v37, 0  ;;  %v209_v55 = vsel %vm206_vm15, %v208_v53, %v204_v52  ;;  %vm344_vm5 = vmor %vm342_vm4, %vm343_vm3 }
 0x2aa   :  { %v221_v41 = vsel %vm219_vm2, %v215_v39, 0  ;;  %v339_v56 = vsub.f32 1.0, %v338_v50  ;;  %v211_v57 = vmul.f32 %v1086_v61, %v209_v55 }
 0x2ab   :  { %230 = vmatpush.bf16.msra.mxu3 %v221_v41 }
 0x2ac   :  { %v340_v58 = vmul.f32 %v865_v44, %v339_v56  ;;  %v213_v60 = vpack.c.bf16 %v211_v57, %v211_v57 }
 0x2ae   :  { %809 = vmatmul.msk.bf16.vlgmr.msra.gmra.mxu3 %vm120_vm1, %v212_v42  ;;  %v341_v62 = vadd.f32 %v865_v44, %v340_v58 }
 0x2af   :  { %817 = vmatmul.msk.bf16.vlgmr.msra.gmra.mxu2 %vm120_vm1, %v441_v31 }
 0x2b0   :  { %v537_v47 = vpop.permute.xlu2 %536  ;;  %v345_v3 = vsel %vm344_vm5, %v865_v44, %v341_v62 }
 0x2b1   :  { %v542_v48 = vsel %vm219_vm2, %v537_v47, 0  ;;  %v237_v49 = vpop.permute.xlu1 %236  ;;  %v350_v5 = vsel %vm347_vm6, %v349_v4, %v345_v3 }
 0x2b2   :  { %551 = vmatpush.bf16.msrb.mxu0 %v542_v48  ;;  %v242_v51 = vsel %vm219_vm2, %v237_v49, 0  ;;  %v352_v61 = vmul.f32 %v1090_v0, %v350_v5 }
 0x2b3   :  { %251 = vmatpush.bf16.msrb.mxu3 %v242_v51 }
 0x2b4   :  { %v354_v7 = vpack.c.bf16 %v352_v61, %v352_v61 }
 0x2b7   :  { %391 = vmatpush.bf16.msra.mxu3 %v382_v54 }
 0x2b8   :  { %v629_v22 = vpop.permute.xlu2 %628 }
 0x2b9   :  { %v466_v59 = vpop.permute.xlu1 %465  ;;  %v634_v25 = vsel %vm120_vm1, %v629_v22, 0 }
 0x2ba   :  { %v471_v63 = vsel %vm120_vm1, %v466_v59, 0 }
 0x2be   :  { %810 = vmatmul.msk.bf16.vlgmr.msrb.gmra.mxu3 %vm120_vm1, %v213_v60 }
 0x2bf   :  { %480 = vmatpush.bf16.xpose.msrb.mxu3 %v471_v63 }
 0x2c0   :  { %v604_v57 = vpop.permute.xlu2 %603 }
 0x2c1   :  { %v464_v8 = vpop.permute.xlu1 %463 }
 0x2c8   :  { %v627_v58 = vpop.permute.xlu2 %626 }
 0x2ce   :  { %814 = vmatmul.msk.bf16.vlgmr.msra.gmra.mxu3 %vm120_vm1, %v354_v7 }
 0x2de   :  { %818 = vmatmul.msk.bf16.vlgmr.msrb.gmra.mxu3 %vm120_vm1, %v464_v8 }
 0x322   :  { %v372_v12 = vpop.f32.mrf.mxu2 }
 0x32a   :  { %v374_v13 = vpop.f32.mrf.mxu2 }
 0x331   :  { %v232_v14 = vpop.f32.mrf.mxu3 }
 0x332   :  { %v459_v15 = vpop.f32.mrf.mxu2 }
 0x333   :  { %v460_v16 = vadd.f32 %v459_v15, %v1065_v27 }
 0x335   :  { %v486_v17 = vsel %vm120_vm1, %v460_v16, -inf }
 0x336   :  { %487 = vmax.xlane.f32.xlu1 %v486_v17 }
 0x339   :  { %v234_v0 = vpop.f32.mrf.mxu3 }
 0x33a   :  { %v461_v18 = vpop.f32.mrf.mxu2 }
 0x341   :  { %v253_v19 = vpop.f32.mrf.mxu3 }
 0x342   :  { %v257_v20 = vpack.c.bf16 %v253_v19, %v232_v14 }
 0x344   :  { %816 = vmatmul.msk.bf16.vlgmr.msra.gmra.mxu1 %vm120_vm1, %v257_v20 }
 0x349   :  { %v255_v21 = vpop.f32.mrf.mxu3 }
 0x34f   :  { %557 = vrot.lane.b32.xlu1 %v1048_v10, %s996_s9 }
 0x351   :  { %v393_v23 = vpop.f32.mrf.mxu3 }
 0x352   :  { %v397_v24 = vpack.c.bf16 %v393_v23, %v372_v12 }
 0x354   :  { %815 = vmatmul.msk.bf16.vlgmr.msra.gmra.mxu0 %vm120_vm1, %v397_v24 }
 0x355   :  { %643 = vmatpush.bf16.xpose.msra.mxu0 %v634_v25 }
 0x359   :  { %v395_v26 = vpop.f32.mrf.mxu3 }
 0x361   :  { %v482_v28 = vpop.f32.mrf.mxu3 }
 0x362   :  { %v483_v40 = vadd.f32 %v482_v28, %v1065_v27 }
 0x364   :  { %v489_v41 = vsel %vm120_vm1, %v483_v40, -inf }
 0x369   :  { %v484_v29 = vpop.f32.mrf.mxu3 }
 0x3a9   :  { %v488_v30 = vpop.xlane.xlu1 %487 }
 0x3aa   :  { %v492_v31 = vsub.f32 %v460_v16, %v488_v30 }
 0x3ac   :  { %v494_v32 = vmul.f32 1.442695, %v492_v31 }
 0x3ae   :  { %866 = vpow2.f32 %v494_v32 }
 0x3b4   :  { %v867_v33 = vpop.eup %866 }
 0x3b5   :  { %v498_v34 = vsel %vm120_vm1, %v867_v33, 0.0 }
 0x3b6   :  { %499 = vadd.xlane.f32.xlu0 %v498_v34 }
 0x3c1   :  { %v558_v35 = vpop.permute.xlu1 %557  ;;  %v435_v37 = vpop.f32.mrf.mxu1 }
 0x3c2   :  { %v563_v36 = vsel %vm219_vm2, %v558_v35, 0 }
 0x3c3   :  { %572 = vmatpush.bf16.msrb.mxu1 %v563_v36  ;;  %v580_v36 = vld [vmem:[#allocation7 + $0x8] sm:$0xf] }
 0x3ca   :  { %605 = vrot.lane.b32.xlu0 %v1044_v6, %s997_s10 }
 0x3d1   :  { %v415_v38 = vpop.f32.mrf.mxu0 }
 0x3d2   :  { %v1138_v39 = vadd.f32 %v435_v37, %v415_v38  ;;  %v585_v37 = vsel %vm219_vm2, %v580_v36, 0  ;;  %v1159_v38 = vpop.f32.mrf.mxu1 }
 0x3d3   :  { %594 = vmatpush.bf16.msrb.mxu2 %v585_v37 }
 0x3d9   :  { %v1147_v2 = vpop.f32.mrf.mxu0 }
 0x3f4   :  { %490 = vmax.xlane.f32.xlu0 %v489_v41 }
 0x429   :  { %v500_v42 = vpop.xlane.xlu0 %499 }
 0x42a   :  { %868 = vrcp.f32 %v500_v42  ;;  %v515_v46 = vand.u32 2147483648, %v500_v42  ;;  %v513_v48 = vand.u32 2147483647, %v500_v42  ;;  %vm509_vm8 = vweird.f32 %v500_v42 }
 0x42c   :  { %v516_v50 = vor.u32 1.1754944e-38, %v515_v46  ;;  %vm514_vm10 = vcmp.eq.f32.partialorder %v513_v48, 8.507059e+37 }
 0x430   :  { %v869_v43 = vpop.eup %868 }
 0x431   :  { %v505_v44 = vmul.f32 %v869_v43, %v500_v42  ;;  %vm510_vm7 = vweird.f32 %v869_v43 }
 0x432   :  { %vm511_vm9 = vmor %vm509_vm8, %vm510_vm7 }
 0x433   :  { %v506_v45 = vsub.f32 1.0, %v505_v44 }
 0x435   :  { %v507_v47 = vmul.f32 %v869_v43, %v506_v45 }
 0x437   :  { %v508_v49 = vadd.f32 %v869_v43, %v507_v47 }
 0x439   :  { %v512_v51 = vsel %vm511_vm9, %v869_v43, %v508_v49 }
 0x43a   :  { %v517_v52 = vsel %vm514_vm10, %v516_v50, %v512_v51 }
 0x43b   :  { %v532_v53 = vmul.f32 %v867_v33, %v517_v52 }
 0x43c   :  { %v606_v54 = vpop.permute.xlu0 %605 }
 0x43d   :  { %v611_v55 = vsel %vm120_vm1, %v606_v54, 0  ;;  %v534_v56 = vpack.c.bf16 %v532_v53, %v532_v53 }
 0x43e   :  { %620 = vmatpush.bf16.xpose.msra.mxu3 %v611_v55 }
 0x43f   :  { %819 = vmatmul.msk.bf16.vlgmr.msrb.gmra.mxu0 %vm120_vm1, %v534_v56 }
 0x445   :  { %822 = vmatmul.msk.bf16.vlgmr.msra.gmra.mxu3 %vm120_vm1, %v604_v57 }
 0x44f   :  { %823 = vmatmul.msk.bf16.vlgmr.msra.gmra.mxu0 %vm120_vm1, %v627_v58 }
 0x467   :  { %v491_v59 = vpop.xlane.xlu0 %490 }
 0x468   :  { %v493_v60 = vsub.f32 %v483_v40, %v491_v59 }
 0x46a   :  { %v496_v62 = vmul.f32 1.442695, %v493_v60 }
 0x46c   :  { %870 = vpow2.f32 %v496_v62 }
 0x472   :  { %v871_v63 = vpop.eup %870 }
 0x473   :  { %v501_v1 = vsel %vm120_vm1, %v871_v63, 0.0 }
 0x474   :  { %502 = vadd.xlane.f32.xlu2 %v501_v1 }
 0x4bc   :  { %v553_v3 = vpop.f32.mrf.mxu0 }
 0x4c4   :  { %v555_v4 = vpop.f32.mrf.mxu0 }
 0x4c8   :  { %v622_v5 = vpop.f32.mrf.mxu3 }
 0x4c9   :  { %v623_v61 = vadd.f32 %v622_v5, %v1065_v27 }
 0x4cb   :  { %v649_v7 = vsel %vm120_vm1, %v623_v61, -inf }
 0x4cc   :  { %v645_v8 = vpop.f32.mrf.mxu0  ;;  %650 = vmax.xlane.f32.xlu0 %v649_v7 }
 0x4cd   :  { %v646_v9 = vadd.f32 %v645_v8, %v1065_v27 }
 0x4cf   :  { %v652_v11 = vsel %vm120_vm1, %v646_v9, -inf }
 0x4d0   :  { %653 = vmax.xlane.f32.xlu1 %v652_v11  ;;  %v624_v12 = vpop.f32.mrf.mxu3 }
 0x4d4   :  { %v647_v13 = vpop.f32.mrf.mxu0 }
 0x4d5   :  { %v743_v13 = vld [vmem:[#allocation7 + $0xc] sm:$0xf] }
 0x4e7   :  { %v503_v14 = vpop.xlane.xlu2 %502 }
 0x4e8   :  { %872 = vrcp.f32 %v503_v14  ;;  %v529_v0 = vand.u32 2147483648, %v503_v14  ;;  %v527_v19 = vand.u32 2147483647, %v503_v14  ;;  %vm523_vm12 = vweird.f32 %v503_v14 }
 0x4ea   :  { %v530_v21 = vor.u32 1.1754944e-38, %v529_v0  ;;  %vm528_vm14 = vcmp.eq.f32.partialorder %v527_v19, 8.507059e+37 }
 0x4ee   :  { %v873_v15 = vpop.eup %872 }
 0x4ef   :  { %v519_v16 = vmul.f32 %v873_v15, %v503_v14  ;;  %vm524_vm11 = vweird.f32 %v873_v15  ;;  %v748_v14 = vsel %vm219_vm2, %v743_v13, 0 }
 0x4f0   :  { %vm525_vm13 = vmor %vm523_vm12, %vm524_vm11  ;;  %757 = vmatpush.bf16.msrb.mxu3 %v748_v14 }
 0x4f1   :  { %v520_v17 = vsub.f32 1.0, %v519_v16 }
 0x4f3   :  { %v521_v18 = vmul.f32 %v873_v15, %v520_v17 }
 0x4f5   :  { %v522_v20 = vadd.f32 %v873_v15, %v521_v18 }
 0x4f7   :  { %v526_v22 = vsel %vm525_vm13, %v873_v15, %v522_v20  ;;  %v849_v20 = vld [vmem:[%s1182_s3] ss:$0 sm:$0xff]  ;;  %s1001_s3 = smov 128  }
 0x4f8   :  { %v531_v27 = vsel %vm528_vm14, %v530_v21, %v526_v22 }
 0x4f9   :  { %v533_v23 = vmul.f32 %v871_v63, %v531_v27 }
 0x4fb   :  { %v535_v24 = vpack.c.bf16 %v533_v23, %v533_v23 }
 0x4fd   :  { %820 = vmatmul.msk.bf16.vlgmr.msrb.gmra.mxu1 %vm120_vm1, %v535_v24 }
 0x53f   :  { %v651_v25 = vpop.xlane.xlu0 %650 }
 0x540   :  { %v655_v26 = vsub.f32 %v623_v61, %v651_v25 }
 0x542   :  { %v657_v28 = vmul.f32 1.442695, %v655_v26 }
 0x543   :  { %v654_v29 = vpop.xlane.xlu1 %653 }
 0x544   :  { %874 = vpow2.f32 %v657_v28  ;;  %v656_v30 = vsub.f32 %v646_v9, %v654_v29 }
 0x546   :  { %v659_v31 = vmul.f32 1.442695, %v656_v30 }
 0x548   :  { %876 = vpow2.f32 %v659_v31 }
 0x54a   :  { %v875_v32 = vpop.eup %874 }
 0x54b   :  { %v661_v33 = vsel %vm120_vm1, %v875_v32, 0.0 }
 0x54c   :  { %662 = vadd.xlane.f32.xlu0 %v661_v33 }
 0x54e   :  { %v877_v34 = vpop.eup %876 }
 0x54f   :  { %v664_v35 = vsel %vm120_vm1, %v877_v34, 0.0 }
 0x550   :  { %665 = vadd.xlane.f32.xlu2 %v664_v35 }
 0x560   :  { %699 = vrot.lane.b32.xlu0 %v1044_v6, %s999_s12 }
 0x568   :  { %720 = vrot.lane.b32.xlu2 %v1048_v10, %s999_s12 }
 0x57a   :  { %v574_v40 = vpop.f32.mrf.mxu1 }
 0x57b   :  { %v578_v41 = vpack.c.bf16 %v574_v40, %v553_v3 }
 0x57d   :  { %821 = vmatmul.msk.bf16.vlgmr.msrb.gmra.mxu2 %vm120_vm1, %v578_v41 }
 0x582   :  { %v576_v42 = vpop.f32.mrf.mxu1 }
 0x5bf   :  { %v663_v43 = vpop.xlane.xlu0 %662 }
 0x5c0   :  { %878 = vrcp.f32 %v663_v43  ;;  %v676_v49 = vand.u32 2147483647, %v663_v43  ;;  %v678_v50 = vand.u32 2147483648, %v663_v43  ;;  %vm672_vm3 = vweird.f32 %v663_v43 }
 0x5c2   :  { %vm677_vm5 = vcmp.eq.f32.partialorder %v676_v49, 8.507059e+37  ;;  %v679_v55 = vor.u32 1.1754944e-38, %v678_v50 }
 0x5c3   :  { %v666_v44 = vpop.xlane.xlu2 %665 }
 0x5c4   :  { %880 = vrcp.f32 %v666_v44  ;;  %v692_v56 = vand.u32 2147483648, %v666_v44  ;;  %v690_v59 = vand.u32 2147483647, %v666_v44  ;;  %vm686_vm7 = vweird.f32 %v666_v44 }
 0x5c6   :  { %v879_v45 = vpop.eup %878  ;;  %v693_v1 = vor.u32 1.1754944e-38, %v692_v56  ;;  %vm691_vm9 = vcmp.eq.f32.partialorder %v690_v59, 8.507059e+37 }
 0x5c7   :  { %v668_v46 = vmul.f32 %v879_v45, %v663_v43  ;;  %vm673_vm15 = vweird.f32 %v879_v45 }
 0x5c8   :  { %vm674_vm4 = vmor %vm672_vm3, %vm673_vm15 }
 0x5c9   :  { %v669_v47 = vsub.f32 1.0, %v668_v46 }
 0x5ca   :  { %v881_v48 = vpop.eup %880 }
 0x5cb   :  { %v670_v6 = vmul.f32 %v879_v45, %v669_v47  ;;  %v682_v10 = vmul.f32 %v881_v48, %v666_v44  ;;  %v721_v51 = vpop.permute.xlu2 %720  ;;  %vm687_vm6 = vweird.f32 %v881_v48 }
 0x5cc   :  { %v726_v52 = vsel %vm219_vm2, %v721_v51, 0  ;;  %vm688_vm8 = vmor %vm686_vm7, %vm687_vm6 }
 0x5cd   :  { %v671_v53 = vadd.f32 %v879_v45, %v670_v6  ;;  %v683_v54 = vsub.f32 1.0, %v682_v10  ;;  %735 = vmatpush.bf16.msra.mxu2 %v726_v52 }
 0x5cf   :  { %v675_v57 = vsel %vm674_vm4, %v879_v45, %v671_v53  ;;  %v684_v58 = vmul.f32 %v881_v48, %v683_v54 }
 0x5d0   :  { %v680_v60 = vsel %vm677_vm5, %v679_v55, %v675_v57 }
 0x5d1   :  { %v695_v62 = vmul.f32 %v875_v32, %v680_v60  ;;  %v685_v63 = vadd.f32 %v881_v48, %v684_v58 }
 0x5d2   :  { %v700_v3 = vpop.permute.xlu0 %699 }
 0x5d3   :  { %v689_v4 = vsel %vm688_vm8, %v881_v48, %v685_v63  ;;  %v705_v5 = vsel %vm219_vm2, %v700_v3, 0  ;;  %v697_v8 = vpack.c.bf16 %v695_v62, %v695_v62 }
 0x5d4   :  { %v694_v61 = vsel %vm691_vm9, %v693_v1, %v689_v4  ;;  %714 = vmatpush.bf16.msra.mxu1 %v705_v5 }
 0x5d5   :  { %v696_v7 = vmul.f32 %v877_v34, %v694_v61 }
 0x5d7   :  { %824 = vmatmul.msk.bf16.vlgmr.msra.gmra.mxu1 %vm120_vm1, %v697_v8  ;;  %v698_v9 = vpack.c.bf16 %v696_v7, %v696_v7 }
 0x5d9   :  { %825 = vmatmul.msk.bf16.vlgmr.msra.gmra.mxu2 %vm120_vm1, %v698_v9 }
 0x600   :  { %v596_v11 = vpop.f32.mrf.mxu2 }
 0x601   :  { %v601_v12 = vadd.f32 %v596_v11, %v1138_v39  ;;  %v438_v39 = vadd.f32 %v1159_v38, %v1147_v2 }
 0x608   :  { %v598_v15 = vpop.f32.mrf.mxu2 }
 0x609   :  { %v602_v23 = vadd.f32 %v598_v15, %v438_v39 }
 0x654   :  { %v716_v16 = vpop.f32.mrf.mxu1 }
 0x65c   :  { %v718_v17 = vpop.f32.mrf.mxu1  ;;  %v737_v0 = vpop.f32.mrf.mxu2 }
 0x65d   :  { %v741_v18 = vpack.c.bf16 %v737_v0, %v716_v16 }
 0x65f   :  { %826 = vmatmul.msk.bf16.vlgmr.msrb.gmra.mxu3 %vm120_vm1, %v741_v18 }
 0x664   :  { %v739_v19 = vpop.f32.mrf.mxu2 }
 0x6e2   :  { %v759_v21 = vpop.f32.mrf.mxu3 }
 0x6e3   :  { %v764_v22 = vadd.f32 %v759_v21, %v601_v12 }
 0x6e5   :  { %v770_v27 = vadd.f32 %v849_v20, %v764_v22 }
 0x6e7   :  { %772 = vst.msk [vmem:[#allocation8] sm:$0xff] %vm89_vm0, %v770_v27 }
 0x6ea   :  { %v761_v24 = vpop.f32.mrf.mxu3 }
 0x6eb   :  { %v765_v25 = vadd.f32 %v761_v24, %v602_v23 }
 0x6ed   :  { %v771_v26 = vadd.f32 %v849_v20, %v765_v25 }
 0x6ef   :  { %773 = vst.msk [vmem:[#allocation8 + $0x8] sm:$0xff] %vm89_vm0, %v771_v26 }
 0x6f0   :  { %786 = dma.vmem_to_hbm [thread:$0]  %s779_s16, 256, %s781_s19, [#allocation4], %s1001_s3, %s1001_s3, %s1002_s20  }
 0x6f1   :  { %982 = dma.done.wait [#allocation4], 256  }
 0x6f2   :  { %983 = vsyncadd [#allocation4], 4294967040 }
 0x6f3   :  { %791 = vsyncpa [#allocation3], 1 }
 0x6f4   :  { %792 = vsyncpa [#allocation6], 1 }
 0x6f5   :  { %793 = vsyncpa [#allocation4], 1 }

</bundles_post_ra>
